<compile_context>
chip_gen: v6e
topology: v6e:2x2x1
jax: 0.10.0
libtpu: 0.0.40
codegen_flags: <defaults>
</compile_context>

<pallas_src>
import jax
import jax.numpy as jnp
from jax.experimental import pallas as pl
from jax.experimental.pallas import tpu as pltpu

DIM = 16
NUM_HEADS = 8
HEAD_DIM = DIM // NUM_HEADS              # 2
SCALE = float(DIM / NUM_HEADS) ** -0.5   # 2.0 ** -0.5, as in the PyTorch __init__


def attention_kernel(x_ref, p_ref, o_ref):
    # x_ref: (N, B*D + 1)   row n = [x[0, n, :], x[1, n, :], ..., 1]
    # p_ref: (B*D + 1, 4*B*D) packed params (see pack_params)
    # o_ref: (N, B*D)       column layout (batch, dim)
    N = x_ref.shape[0]
    BD = o_ref.shape[1]                  # B * D
    dh = HEAD_DIM
    BH = BD // dh                        # B * H  (batch and heads packed on lanes)

    P = p_ref[...]
    w1 = P[:, :3 * BD]                   # (BD+1, 3*BD)  qkv block-diag, bias in last row
    w2 = P[:BD, 3 * BD:]                 # (BD, BD)      proj block-diag
    b2 = P[BD:BD + 1, 3 * BD:]           # (1, BD)       proj bias (per-batch replicated)

    # Fused QKV projection on the MXU. QKV bias comes from x's ones column times
    # the last weight row; the attention scale is pre-folded into the q columns.
    qkv = jnp.dot(x_ref[...], w1, preferred_element_type=jnp.float32)     # (N, 3*BD)

    # Per-channel tiles with (batch, head) packed on lanes: each (N, BH) = (8, 16).
    q = [qkv[:, (0 * dh + c) * BH:(0 * dh + c + 1) * BH] for c in range(dh)]
    k = [qkv[:, (1 * dh + c) * BH:(1 * dh + c + 1) * BH] for c in range(dh)]
    v = [qkv[:, (2 * dh + c) * BH:(2 * dh + c + 1) * BH] for c in range(dh)]

    # Scores s_j[i, (b,h)] = sum_c q_c[i,(b,h)] * k_c[j,(b,h)] — pure VPU broadcast
    # math, both batches and all heads processed together (no per-batch loop, no
    # K=2 MXU matmuls).
    s = []
    for j in range(N):                   # static unroll
        sj = q[0] * k[0][j:j + 1, :]
        for c in range(1, dh):
            sj = sj + q[c] * k[c][j:j + 1, :]
        s.append(sj)                     # (N, BH)

    # Numerically stable softmax over j, elementwise across the unrolled tiles.
    m = s[0]
    for j in range(1, N):
        m = jnp.maximum(m, s[j])
    p = [jnp.exp(s[j] - m) for j in range(N)]
    denom = p[0]
    for j in range(1, N):
        denom = denom + p[j]
    inv = pl.reciprocal(denom, approx=True)      # EUP slot; denom >= 1 so safe

    # Attention-weighted values; batches/heads stay packed on lanes.
    o_ch = []
    for c in range(dh):
        acc = p[0] * v[c][0:1, :]
        for j in range(1, N):
            acc = acc + p[j] * v[c][j:j + 1, :]
        o_ch.append(acc * inv)           # (N, BH)

    attended = jnp.concatenate(o_ch, axis=-1)    # (N, BD), cols ordered (c, b, h)

    # Output projection (MXU, block-diag over batch) + bias. The output stays in
    # its natural (N, B*D) layout; the wrapper un-packs it (output is ~1 KiB, so
    # an in-kernel lane-dense pack buys nothing).
    out = jnp.dot(attended, w2, preferred_element_type=jnp.float32) + b2
    o_ref[...] = out.astype(o_ref.dtype)


def pack_params(wqkv, bqkv, wproj, bproj, batch):
    """One-time packing of the Attention parameters into a single slab.

    Returns a (B*D + 1, 4*B*D) float32 array:
      cols [0, 3*B*D)     : block-diagonal (over batch) QKV weight; output columns
                            ordered (component, channel, batch, head); attention
                            scale folded into the q columns; bias in the last row.
      cols [3*B*D, 4*B*D) : rows [0, B*D): block-diagonal proj weight with input
                            rows ordered (channel, batch, head) and output columns
                            (batch, dim); row B*D: proj bias replicated per batch.
    Call this ONCE at setup — it is pure layout plumbing on static weights.
    """
    D, H, dh, B = DIM, NUM_HEADS, HEAD_DIM, batch
    BD, BH = B * D, B * H
    f32 = jnp.float32
    wqkv = jnp.asarray(wqkv, f32)
    bqkv = jnp.asarray(bqkv, f32).reshape(3 * D)
    wproj = jnp.asarray(wproj, f32)
    bproj = jnp.asarray(bproj, f32).reshape(D)

    eyeB = jnp.eye(B, dtype=f32)
    scale3 = jnp.array([SCALE, 1.0, 1.0], f32)   # fold scale into q only

    # PyTorch qkv feature order is (component, head, channel); reorder to
    # (component, channel, head) and fold the attention scale into q.
    wq_t = jnp.transpose(wqkv.reshape(D, 3, H, dh), (0, 1, 3, 2)) \
        * scale3[None, :, None, None]                       # (in, comp, c, h)
    bq_t = jnp.transpose(bqkv.reshape(3, H, dh), (0, 2, 1)) \
        * scale3[:, None, None]                             # (comp, c, h)

    # Block-diagonal QKV weight, output columns ordered (comp, c, batch, head).
    w1_body = jnp.einsum('xy,izch->xizcyh', eyeB, wq_t).reshape(BD, 3 * BD)
    w1_bias = jnp.broadcast_to(bq_t[:, :, None, :], (3, dh, B, H)).reshape(1, 3 * BD)

    # Block-diagonal proj weight: input rows (channel, batch, head), cols (batch, dim).
    wp = wproj.reshape(H, dh, D)                             # (h, c, d)
    w2 = jnp.einsum('xy,hcd->cxhyd', eyeB, wp).reshape(dh * BH, BD)
    b2 = jnp.broadcast_to(bproj[None, :], (B, D)).reshape(1, BD)

    params = jnp.zeros((BD + 1, 4 * BD), f32)
    params = params.at[:BD, :3 * BD].set(w1_body)
    params = params.at[BD, :3 * BD].set(w1_bias[0])
    params = params.at[:BD, 3 * BD:].set(w2)
    params = params.at[BD, 3 * BD:].set(b2[0])
    return params


@jax.jit
def attention_forward(x, params):
    """x: (B, N, D); params: packed slab from pack_params (computed once)."""
    B, N, D = x.shape
    BD = B * D

    # Fold batch onto lanes and append a ones column (folds the QKV bias into the
    # matmul). This is the entire per-call pre-processing, fused under jit.
    x_ng = jnp.transpose(x, (1, 0, 2)).reshape(N, BD)
    x_aug = jnp.concatenate([x_ng, jnp.ones((N, 1), x.dtype)], axis=-1)   # (N, BD+1)

    out2d = pl.pallas_call(
        attention_kernel,
        out_shape=jax.ShapeDtypeStruct((N, BD), x.dtype),
        grid=(1,),
        in_specs=[
            pl.BlockSpec((N, BD + 1), lambda i: (0, 0)),
            pl.BlockSpec((BD + 1, 4 * BD), lambda i: (0, 0)),
        ],
        out_specs=pl.BlockSpec((N, BD), lambda i: (0, 0)),
        compiler_params=pltpu.CompilerParams(
            dimension_semantics=("arbitrary",)),
    )(x_aug, params)

    return jnp.transpose(out2d.reshape(N, B, D), (1, 0, 2))   # (B, N, D)


def reference_forward(x, wqkv, bqkv, wproj, bproj):
    """Pure-JAX replica of the PyTorch forward (dropout = identity)."""
    B, N, D = x.shape
    H, dh = NUM_HEADS, D // NUM_HEADS
    qkv = x @ wqkv + bqkv                                   # (B, N, 3D)
    qkv = qkv.reshape(B, N, 3, H, dh).transpose(2, 0, 3, 1, 4)
    q, k, v = qkv[0], qkv[1], qkv[2]                        # (B, H, N, dh)
    att = jnp.einsum("bhnd,bhmd->bhnm", q, k) * SCALE
    att = jax.nn.softmax(att, axis=-1)
    o = jnp.einsum("bhnm,bhmd->bhnd", att, v)               # (B, H, N, dh)
    o = o.transpose(0, 2, 1, 3).reshape(B, N, D)
    return o @ wproj + bproj


if __name__ == "__main__":
    B, N, D = 2, 8, DIM

    key = jax.random.PRNGKey(0)
    kx, kw1, kb1, kw2, kb2 = jax.random.split(key, 5)

    x = jax.random.normal(kx, (B, N, D), dtype=jnp.float32)
    # Parameters stored directly in the x @ W convention ((in, out) layout).
    wqkv = jax.random.normal(kw1, (D, 3 * D), dtype=jnp.float32) * 0.1
    bqkv = jax.random.normal(kb1, (1, 3 * D), dtype=jnp.float32) * 0.1
    wproj = jax.random.normal(kw2, (D, D), dtype=jnp.float32) * 0.1
    bproj = jax.random.normal(kb2, (1, D), dtype=jnp.float32) * 0.1

    # One-time parameter packing (hoisted out of the per-call path).
    params = pack_params(wqkv, bqkv, wproj, bproj, batch=B)
    params = jax.block_until_ready(params)

    out = attention_forward(x, params)
    out = jax.block_until_ready(out)

    ref = reference_forward(x, wqkv, bqkv, wproj, bproj)
    assert out.shape == (B, N, D)
    max_err = jnp.max(jnp.abs(out - ref))
    # pl.reciprocal(approx=True) contributes ~2^-12 relative error; 2e-3 is ample.
    assert jnp.allclose(out, ref, atol=2e-3, rtol=2e-3), (
        f"mismatch vs reference (max abs err {max_err})")

    print("KERNEL_OK")
</pallas_src>

<mosaic_0001>
module attributes {stable_mosaic.version = 11 : i64} {
  func.func @attention_kernel(%arg0: i32, %arg1: memref<8x33xf32, #tpu.memory_space<vmem>>, %arg2: memref<33x128xf32, #tpu.memory_space<vmem>>, %arg3: memref<8x32xf32, #tpu.memory_space<vmem>>) attributes {dimension_semantics = [#tpu.dimension_semantics<arbitrary>], iteration_bounds = array<i64: 1>, scalar_prefetch = 0 : i64, scratch_operands = 0 : i64, tpu.core_type = #tpu.core_type<tc>, window_params = [{pipeline_mode = #tpu.pipeline_mode<synchronous>, transform_indices = @transform_0, window_bounds = array<i64: 8, 33>}, {pipeline_mode = #tpu.pipeline_mode<synchronous>, transform_indices = @transform_1, window_bounds = array<i64: 33, 128>}, {pipeline_mode = #tpu.pipeline_mode<synchronous>, transform_indices = @transform_2, window_bounds = array<i64: 8, 32>}]} {
    %c0 = arith.constant 0 : index
    %c0_0 = arith.constant 0 : index
    %0 = vector.load %arg2[%c0, %c0_0] : memref<33x128xf32, #tpu.memory_space<vmem>>, vector<33x128xf32>
    %1 = vector.extract_strided_slice %0 {offsets = [0, 0], sizes = [33, 96], strides = [1, 1]} : vector<33x128xf32> to vector<33x96xf32>
    %2 = vector.extract_strided_slice %0 {offsets = [0, 96], sizes = [32, 32], strides = [1, 1]} : vector<33x128xf32> to vector<32x32xf32>
    %3 = vector.extract_strided_slice %0 {offsets = [32, 96], sizes = [1, 32], strides = [1, 1]} : vector<33x128xf32> to vector<1x32xf32>
    %c0_1 = arith.constant 0 : index
    %c0_2 = arith.constant 0 : index
    %4 = vector.load %arg1[%c0_1, %c0_2] : memref<8x33xf32, #tpu.memory_space<vmem>>, vector<8x33xf32>
    %cst = arith.constant dense<0.000000e+00> : vector<8x96xf32>
    %5 = tpu.matmul %4, %1, %cst {dimension_numbers = #tpu.dot_dimension_numbers<[1], [0], [0], [1], [0, 0, 1, 1], [], []>} : vector<8x33xf32>, vector<33x96xf32>, vector<8x96xf32> -> vector<8x96xf32>
    %6 = vector.extract_strided_slice %5 {offsets = [0, 0], sizes = [8, 16], strides = [1, 1]} : vector<8x96xf32> to vector<8x16xf32>
    %7 = vector.extract_strided_slice %5 {offsets = [0, 16], sizes = [8, 16], strides = [1, 1]} : vector<8x96xf32> to vector<8x16xf32>
    %8 = vector.extract_strided_slice %5 {offsets = [0, 32], sizes = [8, 16], strides = [1, 1]} : vector<8x96xf32> to vector<8x16xf32>
    %9 = vector.extract_strided_slice %5 {offsets = [0, 48], sizes = [8, 16], strides = [1, 1]} : vector<8x96xf32> to vector<8x16xf32>
    %10 = vector.extract_strided_slice %5 {offsets = [0, 64], sizes = [8, 16], strides = [1, 1]} : vector<8x96xf32> to vector<8x16xf32>
    %11 = vector.extract_strided_slice %5 {offsets = [0, 80], sizes = [8, 16], strides = [1, 1]} : vector<8x96xf32> to vector<8x16xf32>
    %12 = vector.extract_strided_slice %8 {offsets = [0, 0], sizes = [1, 16], strides = [1, 1]} : vector<8x16xf32> to vector<1x16xf32>
    %13 = vector.broadcast %12 : vector<1x16xf32> to vector<8x16xf32>
    %14 = arith.mulf %6, %13 : vector<8x16xf32>
    %15 = vector.extract_strided_slice %9 {offsets = [0, 0], sizes = [1, 16], strides = [1, 1]} : vector<8x16xf32> to vector<1x16xf32>
    %16 = vector.broadcast %15 : vector<1x16xf32> to vector<8x16xf32>
    %17 = arith.mulf %7, %16 : vector<8x16xf32>
    %18 = arith.addf %14, %17 : vector<8x16xf32>
    %19 = vector.extract_strided_slice %8 {offsets = [1, 0], sizes = [1, 16], strides = [1, 1]} : vector<8x16xf32> to vector<1x16xf32>
    %20 = vector.broadcast %19 : vector<1x16xf32> to vector<8x16xf32>
    %21 = arith.mulf %6, %20 : vector<8x16xf32>
    %22 = vector.extract_strided_slice %9 {offsets = [1, 0], sizes = [1, 16], strides = [1, 1]} : vector<8x16xf32> to vector<1x16xf32>
    %23 = vector.broadcast %22 : vector<1x16xf32> to vector<8x16xf32>
    %24 = arith.mulf %7, %23 : vector<8x16xf32>
    %25 = arith.addf %21, %24 : vector<8x16xf32>
    %26 = vector.extract_strided_slice %8 {offsets = [2, 0], sizes = [1, 16], strides = [1, 1]} : vector<8x16xf32> to vector<1x16xf32>
    %27 = vector.broadcast %26 : vector<1x16xf32> to vector<8x16xf32>
    %28 = arith.mulf %6, %27 : vector<8x16xf32>
    %29 = vector.extract_strided_slice %9 {offsets = [2, 0], sizes = [1, 16], strides = [1, 1]} : vector<8x16xf32> to vector<1x16xf32>
    %30 = vector.broadcast %29 : vector<1x16xf32> to vector<8x16xf32>
    %31 = arith.mulf %7, %30 : vector<8x16xf32>
    %32 = arith.addf %28, %31 : vector<8x16xf32>
    %33 = vector.extract_strided_slice %8 {offsets = [3, 0], sizes = [1, 16], strides = [1, 1]} : vector<8x16xf32> to vector<1x16xf32>
    %34 = vector.broadcast %33 : vector<1x16xf32> to vector<8x16xf32>
    %35 = arith.mulf %6, %34 : vector<8x16xf32>
    %36 = vector.extract_strided_slice %9 {offsets = [3, 0], sizes = [1, 16], strides = [1, 1]} : vector<8x16xf32> to vector<1x16xf32>
    %37 = vector.broadcast %36 : vector<1x16xf32> to vector<8x16xf32>
    %38 = arith.mulf %7, %37 : vector<8x16xf32>
    %39 = arith.addf %35, %38 : vector<8x16xf32>
    %40 = vector.extract_strided_slice %8 {offsets = [4, 0], sizes = [1, 16], strides = [1, 1]} : vector<8x16xf32> to vector<1x16xf32>
    %41 = vector.broadcast %40 : vector<1x16xf32> to vector<8x16xf32>
    %42 = arith.mulf %6, %41 : vector<8x16xf32>
    %43 = vector.extract_strided_slice %9 {offsets = [4, 0], sizes = [1, 16], strides = [1, 1]} : vector<8x16xf32> to vector<1x16xf32>
    %44 = vector.broadcast %43 : vector<1x16xf32> to vector<8x16xf32>
    %45 = arith.mulf %7, %44 : vector<8x16xf32>
    %46 = arith.addf %42, %45 : vector<8x16xf32>
    %47 = vector.extract_strided_slice %8 {offsets = [5, 0], sizes = [1, 16], strides = [1, 1]} : vector<8x16xf32> to vector<1x16xf32>
    %48 = vector.broadcast %47 : vector<1x16xf32> to vector<8x16xf32>
    %49 = arith.mulf %6, %48 : vector<8x16xf32>
    %50 = vector.extract_strided_slice %9 {offsets = [5, 0], sizes = [1, 16], strides = [1, 1]} : vector<8x16xf32> to vector<1x16xf32>
    %51 = vector.broadcast %50 : vector<1x16xf32> to vector<8x16xf32>
    %52 = arith.mulf %7, %51 : vector<8x16xf32>
    %53 = arith.addf %49, %52 : vector<8x16xf32>
    %54 = vector.extract_strided_slice %8 {offsets = [6, 0], sizes = [1, 16], strides = [1, 1]} : vector<8x16xf32> to vector<1x16xf32>
    %55 = vector.broadcast %54 : vector<1x16xf32> to vector<8x16xf32>
    %56 = arith.mulf %6, %55 : vector<8x16xf32>
    %57 = vector.extract_strided_slice %9 {offsets = [6, 0], sizes = [1, 16], strides = [1, 1]} : vector<8x16xf32> to vector<1x16xf32>
    %58 = vector.broadcast %57 : vector<1x16xf32> to vector<8x16xf32>
    %59 = arith.mulf %7, %58 : vector<8x16xf32>
    %60 = arith.addf %56, %59 : vector<8x16xf32>
    %61 = vector.extract_strided_slice %8 {offsets = [7, 0], sizes = [1, 16], strides = [1, 1]} : vector<8x16xf32> to vector<1x16xf32>
    %62 = vector.broadcast %61 : vector<1x16xf32> to vector<8x16xf32>
    %63 = arith.mulf %6, %62 : vector<8x16xf32>
    %64 = vector.extract_strided_slice %9 {offsets = [7, 0], sizes = [1, 16], strides = [1, 1]} : vector<8x16xf32> to vector<1x16xf32>
    %65 = vector.broadcast %64 : vector<1x16xf32> to vector<8x16xf32>
    %66 = arith.mulf %7, %65 : vector<8x16xf32>
    %67 = arith.addf %63, %66 : vector<8x16xf32>
    %68 = arith.maximumf %18, %25 : vector<8x16xf32>
    %69 = arith.maximumf %68, %32 : vector<8x16xf32>
    %70 = arith.maximumf %69, %39 : vector<8x16xf32>
    %71 = arith.maximumf %70, %46 : vector<8x16xf32>
    %72 = arith.maximumf %71, %53 : vector<8x16xf32>
    %73 = arith.maximumf %72, %60 : vector<8x16xf32>
    %74 = arith.maximumf %73, %67 : vector<8x16xf32>
    %75 = arith.subf %18, %74 : vector<8x16xf32>
    %76 = math.exp %75 : vector<8x16xf32>
    %77 = arith.subf %25, %74 : vector<8x16xf32>
    %78 = math.exp %77 : vector<8x16xf32>
    %79 = arith.subf %32, %74 : vector<8x16xf32>
    %80 = math.exp %79 : vector<8x16xf32>
    %81 = arith.subf %39, %74 : vector<8x16xf32>
    %82 = math.exp %81 : vector<8x16xf32>
    %83 = arith.subf %46, %74 : vector<8x16xf32>
    %84 = math.exp %83 : vector<8x16xf32>
    %85 = arith.subf %53, %74 : vector<8x16xf32>
    %86 = math.exp %85 : vector<8x16xf32>
    %87 = arith.subf %60, %74 : vector<8x16xf32>
    %88 = math.exp %87 : vector<8x16xf32>
    %89 = arith.subf %67, %74 : vector<8x16xf32>
    %90 = math.exp %89 : vector<8x16xf32>
    %91 = arith.addf %76, %78 : vector<8x16xf32>
    %92 = arith.addf %91, %80 : vector<8x16xf32>
    %93 = arith.addf %92, %82 : vector<8x16xf32>
    %94 = arith.addf %93, %84 : vector<8x16xf32>
    %95 = arith.addf %94, %86 : vector<8x16xf32>
    %96 = arith.addf %95, %88 : vector<8x16xf32>
    %97 = arith.addf %96, %90 : vector<8x16xf32>
    %98 = tpu.reciprocal %97 {approx = true} : vector<8x16xf32> -> vector<8x16xf32>
    %99 = vector.extract_strided_slice %10 {offsets = [0, 0], sizes = [1, 16], strides = [1, 1]} : vector<8x16xf32> to vector<1x16xf32>
    %100 = vector.broadcast %99 : vector<1x16xf32> to vector<8x16xf32>
    %101 = arith.mulf %76, %100 : vector<8x16xf32>
    %102 = vector.extract_strided_slice %10 {offsets = [1, 0], sizes = [1, 16], strides = [1, 1]} : vector<8x16xf32> to vector<1x16xf32>
    %103 = vector.broadcast %102 : vector<1x16xf32> to vector<8x16xf32>
    %104 = arith.mulf %78, %103 : vector<8x16xf32>
    %105 = arith.addf %101, %104 : vector<8x16xf32>
    %106 = vector.extract_strided_slice %10 {offsets = [2, 0], sizes = [1, 16], strides = [1, 1]} : vector<8x16xf32> to vector<1x16xf32>
    %107 = vector.broadcast %106 : vector<1x16xf32> to vector<8x16xf32>
    %108 = arith.mulf %80, %107 : vector<8x16xf32>
    %109 = arith.addf %105, %108 : vector<8x16xf32>
    %110 = vector.extract_strided_slice %10 {offsets = [3, 0], sizes = [1, 16], strides = [1, 1]} : vector<8x16xf32> to vector<1x16xf32>
    %111 = vector.broadcast %110 : vector<1x16xf32> to vector<8x16xf32>
    %112 = arith.mulf %82, %111 : vector<8x16xf32>
    %113 = arith.addf %109, %112 : vector<8x16xf32>
    %114 = vector.extract_strided_slice %10 {offsets = [4, 0], sizes = [1, 16], strides = [1, 1]} : vector<8x16xf32> to vector<1x16xf32>
    %115 = vector.broadcast %114 : vector<1x16xf32> to vector<8x16xf32>
    %116 = arith.mulf %84, %115 : vector<8x16xf32>
    %117 = arith.addf %113, %116 : vector<8x16xf32>
    %118 = vector.extract_strided_slice %10 {offsets = [5, 0], sizes = [1, 16], strides = [1, 1]} : vector<8x16xf32> to vector<1x16xf32>
    %119 = vector.broadcast %118 : vector<1x16xf32> to vector<8x16xf32>
    %120 = arith.mulf %86, %119 : vector<8x16xf32>
    %121 = arith.addf %117, %120 : vector<8x16xf32>
    %122 = vector.extract_strided_slice %10 {offsets = [6, 0], sizes = [1, 16], strides = [1, 1]} : vector<8x16xf32> to vector<1x16xf32>
    %123 = vector.broadcast %122 : vector<1x16xf32> to vector<8x16xf32>
    %124 = arith.mulf %88, %123 : vector<8x16xf32>
    %125 = arith.addf %121, %124 : vector<8x16xf32>
    %126 = vector.extract_strided_slice %10 {offsets = [7, 0], sizes = [1, 16], strides = [1, 1]} : vector<8x16xf32> to vector<1x16xf32>
    %127 = vector.broadcast %126 : vector<1x16xf32> to vector<8x16xf32>
    %128 = arith.mulf %90, %127 : vector<8x16xf32>
    %129 = arith.addf %125, %128 : vector<8x16xf32>
    %130 = arith.mulf %129, %98 : vector<8x16xf32>
    %131 = vector.extract_strided_slice %11 {offsets = [0, 0], sizes = [1, 16], strides = [1, 1]} : vector<8x16xf32> to vector<1x16xf32>
    %132 = vector.broadcast %131 : vector<1x16xf32> to vector<8x16xf32>
    %133 = arith.mulf %76, %132 : vector<8x16xf32>
    %134 = vector.extract_strided_slice %11 {offsets = [1, 0], sizes = [1, 16], strides = [1, 1]} : vector<8x16xf32> to vector<1x16xf32>
    %135 = vector.broadcast %134 : vector<1x16xf32> to vector<8x16xf32>
    %136 = arith.mulf %78, %135 : vector<8x16xf32>
    %137 = arith.addf %133, %136 : vector<8x16xf32>
    %138 = vector.extract_strided_slice %11 {offsets = [2, 0], sizes = [1, 16], strides = [1, 1]} : vector<8x16xf32> to vector<1x16xf32>
    %139 = vector.broadcast %138 : vector<1x16xf32> to vector<8x16xf32>
    %140 = arith.mulf %80, %139 : vector<8x16xf32>
    %141 = arith.addf %137, %140 : vector<8x16xf32>
    %142 = vector.extract_strided_slice %11 {offsets = [3, 0], sizes = [1, 16], strides = [1, 1]} : vector<8x16xf32> to vector<1x16xf32>
    %143 = vector.broadcast %142 : vector<1x16xf32> to vector<8x16xf32>
    %144 = arith.mulf %82, %143 : vector<8x16xf32>
    %145 = arith.addf %141, %144 : vector<8x16xf32>
    %146 = vector.extract_strided_slice %11 {offsets = [4, 0], sizes = [1, 16], strides = [1, 1]} : vector<8x16xf32> to vector<1x16xf32>
    %147 = vector.broadcast %146 : vector<1x16xf32> to vector<8x16xf32>
    %148 = arith.mulf %84, %147 : vector<8x16xf32>
    %149 = arith.addf %145, %148 : vector<8x16xf32>
    %150 = vector.extract_strided_slice %11 {offsets = [5, 0], sizes = [1, 16], strides = [1, 1]} : vector<8x16xf32> to vector<1x16xf32>
    %151 = vector.broadcast %150 : vector<1x16xf32> to vector<8x16xf32>
    %152 = arith.mulf %86, %151 : vector<8x16xf32>
    %153 = arith.addf %149, %152 : vector<8x16xf32>
    %154 = vector.extract_strided_slice %11 {offsets = [6, 0], sizes = [1, 16], strides = [1, 1]} : vector<8x16xf32> to vector<1x16xf32>
    %155 = vector.broadcast %154 : vector<1x16xf32> to vector<8x16xf32>
    %156 = arith.mulf %88, %155 : vector<8x16xf32>
    %157 = arith.addf %153, %156 : vector<8x16xf32>
    %158 = vector.extract_strided_slice %11 {offsets = [7, 0], sizes = [1, 16], strides = [1, 1]} : vector<8x16xf32> to vector<1x16xf32>
    %159 = vector.broadcast %158 : vector<1x16xf32> to vector<8x16xf32>
    %160 = arith.mulf %90, %159 : vector<8x16xf32>
    %161 = arith.addf %157, %160 : vector<8x16xf32>
    %162 = arith.mulf %161, %98 : vector<8x16xf32>
    %163 = tpu.concatenate %130, %162 in 1 : vector<8x16xf32>, vector<8x16xf32> -> vector<8x32xf32>
    %cst_3 = arith.constant dense<0.000000e+00> : vector<8x32xf32>
    %164 = tpu.matmul %163, %2, %cst_3 {dimension_numbers = #tpu.dot_dimension_numbers<[1], [0], [0], [1], [0, 0, 1, 1], [], []>} : vector<8x32xf32>, vector<32x32xf32>, vector<8x32xf32> -> vector<8x32xf32>
    %165 = vector.broadcast %3 : vector<1x32xf32> to vector<8x32xf32>
    %166 = arith.addf %164, %165 : vector<8x32xf32>
    %c0_4 = arith.constant 0 : index
    %c0_5 = arith.constant 0 : index
    %167 = vector.load %arg3[%c0_4, %c0_5] : memref<8x32xf32, #tpu.memory_space<vmem>>, vector<8x32xf32>
    tpu.vector_store %arg3[%c0_4, %c0_5], %166 {strides = array<i32>} : memref<8x32xf32, #tpu.memory_space<vmem>>, vector<8x32xf32>,
    return
  }
  func.func @transform_0(%arg0: i32) -> (i32, i32) {
    %c0_i32 = arith.constant 0 : i32
    %c0_i32_0 = arith.constant 0 : i32
    %c0_i32_1 = arith.constant 0 : i32
    return %c0_i32, %c0_i32_0 : i32, i32
  }
  func.func @transform_1(%arg0: i32) -> (i32, i32) {
    %c0_i32 = arith.constant 0 : i32
    %c0_i32_0 = arith.constant 0 : i32
    %c0_i32_1 = arith.constant 0 : i32
    return %c0_i32, %c0_i32_0 : i32, i32
  }
  func.func @transform_2(%arg0: i32) -> (i32, i32) {
    %c0_i32 = arith.constant 0 : i32
    %c0_i32_0 = arith.constant 0 : i32
    %c0_i32_1 = arith.constant 0 : i32
    return %c0_i32, %c0_i32_0 : i32, i32
  }
}

</mosaic_0001>

<bundles_post_ra>
// kernel: attention_forward.1
= control target key start
LH: loop header
LB: loop body
LE: loop exit
PB: predicated region body
PF: predicated region fallthrough
CT: control target
= control target key end

     0   :  { %vm21_vm0 = vcmask 1040384   ;;  %v499_v0 = vmov 0.0   ;;  %vm500_vm1 = vmmov 0   ;;  %vm17_vm2 = vcmask 269312   ;;  %s503_s21 = smov 48   ;;  %s504_s22 = smov 64   ;;  %s602_s1 = inlined_call_operand.vmem [shape: f32[33,128], index: 1, kind: input, shape index: {}]   ;;  %s603_s0 = inlined_call_operand.vmem [shape: f32[8,33], index: 0, kind: input, shape index: {}]   ;;  %s604_s2 = inlined_call_operand.vmem [shape: f32[8,32], index: 2, kind: output, shape index: {}]  }
   0x1   :  { %449 = vmatprep.subr.mxu0 %v499_v0  ;;  %v526_v1 = vld [vmem:[%s602_s1 + $0x20] sm:$0x1]  ;;  %v531_v2 = vld [vmem:[%s602_s1 + $0x18] sm:$0xff]  ;;  %459 = vmatprep.mubr.msk.f32.mxu0 %vm500_vm1, %v499_v0  ;;  %v540_v3 = vld [vmem:[%s602_s1 + $0x10] sm:$0xff]  ;;  %v95_v7 = vlaneseq  ;;  %s505_s23 = smov 32   ;;  %s506_s24 = smov 16  }
   0x2   :  { %450 = vmatpush3.msk.msra.mxu0 %vm21_vm0, %v526_v1  ;;  %462 = vmatprep.subr.mxu1 %v499_v0  ;;  %v548_v4 = vld [vmem:[%s602_s1 + $0x8] sm:$0xff]  ;;  %v555_v5 = vld [vmem:[%s602_s1] sm:$0xff]  ;;  %s502_s1 = smov 112   ;;  %vm330_vm3 = vcmask 130048   ;;  %vm356_vm4 = vcmask 261120  }
   0x3   :  { %451 = vmatprep.subr.mxu0 %v499_v0  ;;  %470 = vmatprep.mubr.msk.f32.mxu1 %vm500_vm1, %v499_v0  ;;  %v16_v6 = vld [vmem:[%s603_s0] sm:$0xff]  ;;  %v563_v8 = vshrl.u32 %v95_v7, 7  ;;  %s501_s0 = smov 96  }
   0x4   :  { %452 = vmatpush3.msra.mxu0 %v531_v2 }
   0x5   :  { %453 = vmatprep.subr.mxu0 %v499_v0  ;;  %v97_v9 = vsub.s32 0, %v563_v8  ;;  %v125_v10 = vsub.s32 2, %v563_v8  ;;  %v139_v14 = vsub.s32 3, %v563_v8  ;;  %v111_v15 = vsub.s32 1, %v563_v8 }
   0x6   :  { %454 = vmatpush3.msra.mxu0 %v540_v3  ;;  %v167_v19 = vsub.s32 5, %v563_v8  ;;  %v153_v20 = vsub.s32 4, %v563_v8  ;;  %v195_v23 = vsub.s32 7, %v563_v8  ;;  %v181_v24 = vsub.s32 6, %v563_v8 }
   0x7   :  { %455 = vmatprep.subr.mxu0 %v499_v0 }
   0x8   :  { %456 = vmatpush3.msra.mxu0 %v548_v4 }
   0x9   :  { %457 = vmatprep.subr.mxu0 %v499_v0 }
   0xa   :  { %458 = vmatpush3.msra.mxu0 %v555_v5 }
   0xb   :  { %460 = vmatmul.mubr.msk.f32.vlgmr.msra.gmra.mxu0 %vm17_vm2, %v16_v6 }
  0xcb   :  { %v91_v11 = vpop.f32.mrf.mxu0 }
  0xcc   :  { %v126_v12 = vrot.slane %v91_v11, %v125_v10  ;;  %v98_v13 = vrot.slane %v91_v11, %v97_v9  ;;  %v140_v17 = vrot.slane %v91_v11, %v139_v14  ;;  %v112_v18 = vrot.slane %v91_v11, %v111_v15 }
  0xcd   :  { %v461_v16 = vpop.f32.mrf.mxu0  ;;  %v168_v21 = vrot.slane %v91_v11, %v167_v19  ;;  %v154_v22 = vrot.slane %v91_v11, %v153_v20  ;;  %v196_v25 = vrot.slane %v91_v11, %v195_v23  ;;  %v182_v26 = vrot.slane %v91_v11, %v181_v24 }
  0xce   :  { %128 = vrot.lane.b32.xlu1 %v126_v12, %s501_s0  ;;  %100 = vrot.lane.b32.xlu0 %v98_v13, %s501_s0 }
  0xd2   :  { %142 = vrot.lane.b32.xlu1 %v140_v17, %s501_s0  ;;  %114 = vrot.lane.b32.xlu0 %v112_v18, %s501_s0 }
  0xd6   :  { %170 = vrot.lane.b32.xlu1 %v168_v21, %s501_s0  ;;  %156 = vrot.lane.b32.xlu0 %v154_v22, %s501_s0 }
  0xda   :  { %198 = vrot.lane.b32.xlu1 %v196_v25, %s501_s0  ;;  %184 = vrot.lane.b32.xlu0 %v182_v26, %s501_s0 }
 0x140   :  { %v129_v27 = vpop.permute.xlu1 %128  ;;  %v101_v28 = vpop.permute.xlu0 %100 }
 0x141   :  { %v103_v29 = vmul.f32 %v101_v28, %v91_v11  ;;  %v131_v32 = vmul.f32 %v129_v27, %v91_v11 }
 0x143   :  { %105 = vrot.lane.b32.xlu0 %v103_v29, %s502_s1 }
 0x144   :  { %v143_v30 = vpop.permute.xlu1 %142  ;;  %v115_v31 = vpop.permute.xlu0 %114 }
 0x145   :  { %v117_v33 = vmul.f32 %v115_v31, %v91_v11  ;;  %v145_v36 = vmul.f32 %v143_v30, %v91_v11 }
 0x147   :  { %133 = vrot.lane.b32.xlu0 %v131_v32, %s502_s1  ;;  %119 = vrot.lane.b32.xlu1 %v117_v33, %s502_s1 }
 0x148   :  { %v171_v34 = vpop.permute.xlu1 %170  ;;  %v157_v35 = vpop.permute.xlu0 %156 }
 0x149   :  { %v159_v37 = vmul.f32 %v157_v35, %v91_v11  ;;  %v173_v39 = vmul.f32 %v171_v34, %v91_v11 }
 0x14b   :  { %147 = vrot.lane.b32.xlu1 %v145_v36, %s502_s1  ;;  %161 = vrot.lane.b32.xlu0 %v159_v37, %s502_s1 }
 0x14c   :  { %v185_v38 = vpop.permute.xlu0 %184  ;;  %v199_v41 = vpop.permute.xlu1 %198 }
 0x14d   :  { %v187_v40 = vmul.f32 %v185_v38, %v91_v11  ;;  %v201_v42 = vmul.f32 %v199_v41, %v91_v11 }
 0x14f   :  { %175 = vrot.lane.b32.xlu1 %v173_v39, %s502_s1  ;;  %189 = vrot.lane.b32.xlu0 %v187_v40, %s502_s1 }
 0x153   :  { %203 = vrot.lane.b32.xlu1 %v201_v42, %s502_s1  ;;  %286 = vrot.lane.b32.xlu0 %v98_v13, %s503_s21 }
 0x157   :  { %290 = vrot.lane.b32.xlu1 %v112_v18, %s503_s21  ;;  %295 = vrot.lane.b32.xlu0 %v126_v12, %s503_s21 }
 0x15b   :  { %300 = vrot.lane.b32.xlu1 %v140_v17, %s503_s21  ;;  %305 = vrot.lane.b32.xlu0 %v154_v22, %s503_s21 }
 0x15f   :  { %310 = vrot.lane.b32.xlu1 %v168_v21, %s503_s21  ;;  %315 = vrot.lane.b32.xlu0 %v182_v26, %s503_s21 }
 0x163   :  { %320 = vrot.lane.b32.xlu1 %v196_v25, %s503_s21  ;;  %246 = vrot.lane.b32.xlu0 %v98_v13, %s504_s22 }
 0x167   :  { %250 = vrot.lane.b32.xlu1 %v112_v18, %s504_s22  ;;  %255 = vrot.lane.b32.xlu0 %v126_v12, %s504_s22 }
 0x16b   :  { %260 = vrot.lane.b32.xlu1 %v140_v17, %s504_s22  ;;  %265 = vrot.lane.b32.xlu0 %v154_v22, %s504_s22 }
 0x16f   :  { %270 = vrot.lane.b32.xlu1 %v168_v21, %s504_s22  ;;  %275 = vrot.lane.b32.xlu0 %v182_v26, %s504_s22 }
 0x173   :  { %280 = vrot.lane.b32.xlu1 %v196_v25, %s504_s22  ;;  %346 = vrot.lane.b32.xlu0 %v531_v2, %s505_s23 }
 0x177   :  { %344 = vrot.lane.b32.xlu1 %v540_v3, %s505_s23  ;;  %342 = vrot.lane.b32.xlu0 %v548_v4, %s505_s23 }
 0x17b   :  { %340 = vrot.lane.b32.xlu0 %v555_v5, %s505_s23 }
 0x1b5   :  { %v106_v43 = vpop.permute.xlu0 %105 }
 0x1b6   :  { %v108_v46 = vadd.f32 %v106_v43, %v103_v29 }
 0x1b9   :  { %v120_v44 = vpop.permute.xlu1 %119  ;;  %v134_v45 = vpop.permute.xlu0 %133 }
 0x1ba   :  { %v122_v47 = vadd.f32 %v120_v44, %v117_v33  ;;  %v136_v49 = vadd.f32 %v134_v45, %v131_v32 }
 0x1bc   :  { %v207_v48 = vmax.f32 %v108_v46, %v122_v47 }
 0x1bd   :  { %v148_v50 = vpop.permute.xlu1 %147  ;;  %v162_v51 = vpop.permute.xlu0 %161 }
 0x1be   :  { %v208_v52 = vmax.f32 %v207_v48, %v136_v49  ;;  %v150_v53 = vadd.f32 %v148_v50, %v145_v36  ;;  %v164_v55 = vadd.f32 %v162_v51, %v159_v37 }
 0x1c0   :  { %v209_v54 = vmax.f32 %v208_v52, %v150_v53 }
 0x1c1   :  { %v176_v56 = vpop.permute.xlu1 %175  ;;  %v190_v57 = vpop.permute.xlu0 %189 }
 0x1c2   :  { %v210_v58 = vmax.f32 %v209_v54, %v164_v55  ;;  %v178_v59 = vadd.f32 %v176_v56, %v173_v39  ;;  %v192_v61 = vadd.f32 %v190_v57, %v187_v40 }
 0x1c4   :  { %v211_v60 = vmax.f32 %v210_v58, %v178_v59 }
 0x1c5   :  { %v204_v62 = vpop.permute.xlu1 %203  ;;  %v287_v63 = vpop.permute.xlu0 %286 }
 0x1c6   :  { %v212_v2 = vmax.f32 %v211_v60, %v192_v61  ;;  %v206_v3 = vadd.f32 %v204_v62, %v201_v42 }
 0x1c8   :  { %v213_v4 = vmax.f32 %v212_v2, %v206_v3 }
 0x1c9   :  { %v291_v5 = vpop.permute.xlu1 %290  ;;  %v296_v6 = vpop.permute.xlu0 %295 }
 0x1ca   :  { %v214_v7 = vsub.f32 %v108_v46, %v213_v4  ;;  %v217_v10 = vsub.f32 %v122_v47, %v213_v4  ;;  %v220_v11 = vsub.f32 %v136_v49, %v213_v4  ;;  %v223_v12 = vsub.f32 %v150_v53, %v213_v4 }
 0x1cb   :  { %v226_v13 = vsub.f32 %v164_v55, %v213_v4  ;;  %v229_v16 = vsub.f32 %v178_v59, %v213_v4  ;;  %v232_v20 = vsub.f32 %v192_v61, %v213_v4  ;;  %v235_v23 = vsub.f32 %v206_v3, %v213_v4 }
 0x1cc   :  { %v215_v14 = vmul.f32 1.442695, %v214_v7  ;;  %v218_v15 = vmul.f32 1.442695, %v217_v10  ;;  %v221_v17 = vmul.f32 1.442695, %v220_v11 }
 0x1cd   :  { %v301_v18 = vpop.permute.xlu1 %300  ;;  %v306_v19 = vpop.permute.xlu0 %305  ;;  %v224_v21 = vmul.f32 1.442695, %v223_v12  ;;  %v227_v22 = vmul.f32 1.442695, %v226_v13  ;;  %v230_v24 = vmul.f32 1.442695, %v229_v16 }
 0x1ce   :  { %481 = vpow2.f32 %v215_v14  ;;  %v233_v26 = vmul.f32 1.442695, %v232_v20  ;;  %v236_v28 = vmul.f32 1.442695, %v235_v23 }
 0x1cf   :  { %483 = vpow2.f32 %v218_v15 }
 0x1d0   :  { %485 = vpow2.f32 %v221_v17 }
 0x1d1   :  { %v583_v25 = vpop.permute.xlu1 %310  ;;  %v585_v27 = vpop.permute.xlu0 %315  ;;  %487 = vpow2.f32 %v224_v21 }
 0x1d2   :  { %489 = vpow2.f32 %v227_v22 }
 0x1d3   :  { %491 = vpow2.f32 %v230_v24 }
 0x1d4   :  { %493 = vpow2.f32 %v233_v26 }
 0x1d5   :  { %v587_v29 = vpop.permute.xlu1 %320  ;;  %v247_v30 = vpop.permute.xlu0 %246  ;;  %495 = vpow2.f32 %v236_v28 }
 0x1d9   :  { %v251_v31 = vpop.permute.xlu1 %250  ;;  %v256_v32 = vpop.permute.xlu0 %255 }
 0x1db   :  { %v482_v33 = vpop.eup %481 }
 0x1dc   :  { %v484_v34 = vpop.eup %483  ;;  %v289_v35 = vmul.f32 %v482_v33, %v287_v63  ;;  %v249_v36 = vmul.f32 %v482_v33, %v247_v30 }
 0x1dd   :  { %v261_v37 = vpop.permute.xlu1 %260  ;;  %v266_v38 = vpop.permute.xlu0 %265  ;;  %v293_v40 = vmul.f32 %v484_v34, %v291_v5  ;;  %v253_v41 = vmul.f32 %v484_v34, %v251_v31  ;;  %v238_v42 = vadd.f32 %v484_v34, %v482_v33 }
 0x1de   :  { %v486_v39 = vpop.eup %485 }
 0x1df   :  { %v488_v43 = vpop.eup %487  ;;  %v258_v44 = vmul.f32 %v486_v39, %v256_v32  ;;  %v254_v46 = vadd.f32 %v253_v41, %v249_v36  ;;  %v294_v49 = vadd.f32 %v293_v40, %v289_v35  ;;  %v239_v53 = vadd.f32 %v486_v39, %v238_v42 }
 0x1e0   :  { %v490_v45 = vpop.eup %489  ;;  %v263_v47 = vmul.f32 %v488_v43, %v261_v37  ;;  %v298_v57 = vmul.f32 %v486_v39, %v296_v6  ;;  %v303_v5 = vmul.f32 %v488_v43, %v301_v18 }
 0x1e1   :  { %v492_v48 = vpop.eup %491  ;;  %v268_v50 = vmul.f32 %v490_v45, %v266_v38  ;;  %v271_v51 = vpop.permute.xlu1 %270  ;;  %v259_v55 = vadd.f32 %v258_v44, %v254_v46  ;;  %v240_v59 = vadd.f32 %v488_v43, %v239_v53  ;;  %v308_v14 = vmul.f32 %v490_v45, %v306_v19 }
 0x1e2   :  { %v276_v52 = vpop.permute.xlu0 %275  ;;  %v494_v54 = vpop.eup %493  ;;  %v273_v56 = vmul.f32 %v492_v48, %v271_v51  ;;  %v299_v62 = vadd.f32 %v298_v57, %v294_v49  ;;  %v313_v21 = vmul.f32 %v492_v48, %v583_v25  ;;  %v335_v25 = vrot.slane %v526_v1, %v97_v9 }
 0x1e3   :  { %v278_v58 = vmul.f32 %v494_v54, %v276_v52  ;;  %v264_v60 = vadd.f32 %v263_v47, %v259_v55  ;;  %v496_v61 = vpop.eup %495  ;;  %v241_v2 = vadd.f32 %v490_v45, %v240_v59  ;;  %v318_v19 = vmul.f32 %v494_v54, %v585_v27 }
 0x1e4   :  { %v304_v11 = vadd.f32 %v303_v5, %v299_v62  ;;  %v323_v26 = vmul.f32 %v496_v61, %v587_v29 }
 0x1e5   :  { %v281_v63 = vpop.permute.xlu1 %280  ;;  %v269_v3 = vadd.f32 %v268_v50, %v264_v60  ;;  %v242_v7 = vadd.f32 %v492_v48, %v241_v2 }
 0x1e6   :  { %v283_v4 = vmul.f32 %v496_v61, %v281_v63  ;;  %v347_v16 = vpop.permute.xlu0 %346  ;;  %v309_v20 = vadd.f32 %v308_v14, %v304_v11 }
 0x1e7   :  { %v274_v10 = vadd.f32 %v273_v56, %v269_v3  ;;  %v243_v12 = vadd.f32 %v494_v54, %v242_v7  ;;  %463 = vmatpush3.msra.mxu1 %v347_v16 }
 0x1e8   :  { %464 = vmatprep.subr.mxu1 %v499_v0  ;;  %v314_v22 = vadd.f32 %v313_v21, %v309_v20 }
 0x1e9   :  { %v279_v13 = vadd.f32 %v278_v58, %v274_v10  ;;  %v244_v15 = vadd.f32 %v496_v61, %v243_v12  ;;  %v345_v17 = vpop.permute.xlu1 %344 }
 0x1ea   :  { %465 = vmatpush3.msra.mxu1 %v345_v17  ;;  %v343_v18 = vpop.permute.xlu0 %342  ;;  %v319_v24 = vadd.f32 %v318_v19, %v314_v22 }
 0x1eb   :  { %v284_v6 = vadd.f32 %v283_v4, %v279_v13  ;;  %497 = vrcp.f32 %v244_v15  ;;  %466 = vmatprep.subr.mxu1 %v499_v0 }
 0x1ec   :  { %467 = vmatpush3.msra.mxu1 %v343_v18  ;;  %v324_v28 = vadd.f32 %v323_v26, %v319_v24 }
 0x1ed   :  { %468 = vmatprep.subr.mxu1 %v499_v0 }
 0x1ee   :  { %v341_v23 = vpop.permute.xlu0 %340 }
 0x1ef   :  { %469 = vmatpush3.msra.mxu1 %v341_v23 }
 0x1f8   :  { %v498_v30 = vpop.eup %497 }
 0x1f9   :  { %v285_v31 = vmul.f32 %v498_v30, %v284_v6  ;;  %v325_v32 = vmul.f32 %v498_v30, %v324_v28 }
 0x1fb   :  { %327 = vrot.lane.b32.xlu1 %v325_v32, %s506_s24 }
 0x1ff   :  { %353 = vrot.lane.b32.xlu1 %v335_v25, %s505_s23 }
 0x26d   :  { %v328_v0 = vpop.permute.xlu1 %327 }
 0x26e   :  { %v331_v27 = vsel %vm330_vm3, %v285_v31, %v328_v0 }
 0x26f   :  { %471 = vmatmul.mubr.msk.f32.vlgmr.msra.gmra.mxu1 %vm356_vm4, %v331_v27 }
 0x271   :  { %v354_v33 = vpop.permute.xlu1 %353 }
 0x32f   :  { %v426_v34 = vpop.f32.mrf.mxu1 }
 0x330   :  { %v427_v29 = vadd.f32 %v426_v34, %v354_v33 }
 0x331   :  { %v472_v35 = vpop.f32.mrf.mxu1 }
 0x332   :  { %430 = vst.msk [vmem:[%s604_s2] sm:$0xff] %vm356_vm4, %v427_v29 }

</bundles_post_ra>
